<compile_context>
chip_gen: v5e
topology: v5e:2x2
jax: 0.10.0
libtpu: 0.0.40
codegen_flags: <defaults>
</compile_context>

<pallas_src>
import functools

import jax
import jax.numpy as jnp
from jax.experimental import pallas as pl
from jax.experimental.pallas import tpu as pltpu


def _dot_product_loss_kernel(x_ref, y_ref, loss_ref, acc_xym, acc_m, *,
                             hw_total, tile_hw, needs_lane_mask):
    n = pl.program_id(0)
    t = pl.program_id(1)

    # ---- init accumulators on the very first grid step ----
    @pl.when(jnp.logical_and(n == 0, t == 0))
    def _():
        acc_xym[0] = jnp.float32(0.0)
        acc_m[0] = jnp.float32(0.0)

    # block: (bn, C, tile_hw); upcast to f32 for the accumulation
    x = x_ref[...].astype(jnp.float32)
    y = y_ref[...].astype(jnp.float32)

    # TODO(synk): `mask_invalid_pixels` is undefined in the spec; assumed
    # semantics: pixel valid iff target y is not all-zero over channels.
    valid = jnp.sum(jnp.abs(y), axis=1, keepdims=True) > 0.0        # (bn, 1, T)

    # Per-pixel channel dot product (sublane reduction).
    dot = jnp.sum(x * y, axis=1, keepdims=True)                     # (bn, 1, T)

    if needs_lane_mask:
        # Only emitted when the last HW tile is partial (static decision).
        lane = jax.lax.broadcasted_iota(jnp.int32, (1, 1, tile_hw), 2)
        in_bounds = (t * tile_hw + lane) < hw_total                 # (1, 1, T)
        valid = jnp.logical_and(valid, in_bounds)
        dot = jnp.where(in_bounds, dot, 0.0)                        # guard stale VMEM

    m = valid.astype(jnp.float32)

    acc_xym[0] += jnp.sum(dot * m)
    acc_m[0] += jnp.sum(m)

    # ---- finalize on the last grid step ----
    @pl.when(jnp.logical_and(n == pl.num_programs(0) - 1,
                             t == pl.num_programs(1) - 1))
    def _():
        loss_ref[0, 0] = jnp.float32(1.0) - acc_xym[0] / acc_m[0]


def _round_up(a, b):
    return (a + b - 1) // b * b


def _choose_blocks(N, C, HW, itemsize):
    """Pick (bn, tile_hw): lane-dense HW tile + batch blocking for small HW.

    Targets ~2 MiB of padded VMEM per input block so per-grid-step overhead
    (~0.35 us) is amortized over megabyte-scale DMAs, while double-buffered
    x+y plus f32 temporaries stay comfortably inside scoped VMEM on all
    TPU generations (v5e/v6e/v7x).
    """
    # Sublane padding multiple for the channel axis: f32->8, bf16->16, int8->32.
    sub = max(8, 32 // max(1, itemsize))
    c_pad = _round_up(C, sub)

    target_bytes = 2 * 1024 * 1024
    lane_budget = max(128, (target_bytes // (c_pad * itemsize)) // 128 * 128)

    if HW <= lane_budget:
        tile_hw = HW                               # full-dim block is always legal
        per_n_bytes = c_pad * _round_up(HW, 128) * itemsize
        bn_desired = max(1, min(N, target_bytes // max(1, per_n_bytes)))
        bn = 1
        for d in range(bn_desired, 0, -1):         # largest divisor of N <= desired
            if N % d == 0:
                bn = d
                break
    else:
        tile_hw = lane_budget                      # multiple of 128
        bn = 1
    return bn, tile_hw


def dot_product_loss(x, y):
    """1 - sum(x*y*mask)/sum(mask) over NCHW inputs, via a Pallas TPU kernel."""
    assert x.shape == y.shape, "x and y must have the same shape"
    N, C, H, W = x.shape
    HW = H * W
    x3 = x.reshape(N, C, HW)
    y3 = y.reshape(N, C, HW)

    bn, tile_hw = _choose_blocks(N, C, HW, x3.dtype.itemsize)
    n_tiles = pl.cdiv(HW, tile_hw)
    needs_lane_mask = (HW % tile_hw) != 0

    kernel = functools.partial(_dot_product_loss_kernel,
                               hw_total=HW, tile_hw=tile_hw,
                               needs_lane_mask=needs_lane_mask)

    loss = pl.pallas_call(
        kernel,
        out_shape=jax.ShapeDtypeStruct((1, 1), jnp.float32),
        grid_spec=pltpu.PrefetchScalarGridSpec(
            num_scalar_prefetch=0,
            grid=(N // bn, n_tiles),
            in_specs=[
                pl.BlockSpec((bn, C, tile_hw), lambda n, t: (n, 0, t)),
                pl.BlockSpec((bn, C, tile_hw), lambda n, t: (n, 0, t)),
            ],
            out_specs=pl.BlockSpec(memory_space=pltpu.MemorySpace.SMEM),
            scratch_shapes=[
                pltpu.SMEM((1,), jnp.float32),   # running sum of x*y*mask
                pltpu.SMEM((1,), jnp.float32),   # running sum of mask
            ],
        ),
        compiler_params=pltpu.CompilerParams(
            # Both grid axes feed the single carried accumulator / scalar
            # output, so both are reduction ("arbitrary") axes.
            dimension_semantics=("arbitrary", "arbitrary"),
            vmem_limit_bytes=32 * 1024 * 1024,
        ),
    )(x3, y3)

    return loss[0, 0]


if __name__ == "__main__":
    key = jax.random.PRNGKey(0)
    kx, ky, km = jax.random.split(key, 3)

    N, C, H, W = 2, 4, 16, 16
    x = jax.random.normal(kx, (N, C, H, W), dtype=jnp.float32)
    y = jax.random.normal(ky, (N, C, H, W), dtype=jnp.float32)
    # zero out some target pixels so the invalid-pixel mask is exercised
    invalid = jax.random.bernoulli(km, p=0.25, shape=(N, 1, H, W))
    y = jnp.where(invalid, 0.0, y)

    loss = dot_product_loss(x, y)
    loss = jax.block_until_ready(loss)

    # pure-JAX reference (same assumed mask semantics)
    mask = (jnp.sum(jnp.abs(y), axis=1, keepdims=True) > 0).astype(jnp.float32)
    ref = 1.0 - jnp.sum(x * y * mask) / jnp.sum(mask)

    assert loss.shape == ()
    assert jnp.allclose(loss, ref, atol=1e-5, rtol=1e-5), (loss, ref)

    print("KERNEL_OK")
</pallas_src>

<mosaic_0001>
module attributes {stable_mosaic.version = 11 : i64} {
  func.func @_dot_product_loss_kernel(%arg0: i32, %arg1: i32, %arg2: memref<2x4x256xf32, #tpu.memory_space<vmem>>, %arg3: memref<2x4x256xf32, #tpu.memory_space<vmem>>, %arg4: memref<1x1xf32, #tpu.memory_space<smem>>, %arg5: memref<1xf32, #tpu.memory_space<smem>>, %arg6: memref<1xf32, #tpu.memory_space<smem>>) attributes {dimension_semantics = [#tpu.dimension_semantics<arbitrary>, #tpu.dimension_semantics<arbitrary>], iteration_bounds = array<i64: 1, 1>, scalar_prefetch = 0 : i64, scratch_operands = 2 : i64, tpu.core_type = #tpu.core_type<tc>, window_params = [{transform_indices = @transform_0, window_bounds = array<i64: 2, 4, 256>}, {transform_indices = @transform_1, window_bounds = array<i64: 2, 4, 256>}, {transform_indices = @transform_2, window_bounds = array<i64: 1, 1>}]} {
    %c0_i32 = arith.constant 0 : i32
    %0 = arith.cmpi eq, %arg0, %c0_i32 : i32
    %c0_i32_0 = arith.constant 0 : i32
    %1 = arith.cmpi eq, %arg1, %c0_i32_0 : i32
    %2 = arith.andi %0, %1 : i1
    %3 = arith.extui %2 : i1 to i32
    %c0_i32_1 = arith.constant 0 : i32
    %4 = arith.cmpi ne, %3, %c0_i32_1 : i32
    scf.if %4 {
      %cst_18 = arith.constant 0.000000e+00 : f32
      %c0_19 = arith.constant 0 : index
      %37 = memref.load %arg5[%c0_19] : memref<1xf32, #tpu.memory_space<smem>>
      memref.store %cst_18, %arg5[%c0_19] : memref<1xf32, #tpu.memory_space<smem>>
      %cst_20 = arith.constant 0.000000e+00 : f32
      %c0_21 = arith.constant 0 : index
      %38 = memref.load %arg6[%c0_21] : memref<1xf32, #tpu.memory_space<smem>>
      memref.store %cst_20, %arg6[%c0_21] : memref<1xf32, #tpu.memory_space<smem>>
    } else {
    }
    %c0 = arith.constant 0 : index
    %c0_2 = arith.constant 0 : index
    %c0_3 = arith.constant 0 : index
    %5 = vector.load %arg2[%c0, %c0_2, %c0_3] : memref<2x4x256xf32, #tpu.memory_space<vmem>>, vector<2x4x256xf32>
    %c0_4 = arith.constant 0 : index
    %c0_5 = arith.constant 0 : index
    %c0_6 = arith.constant 0 : index
    %6 = vector.load %arg3[%c0_4, %c0_5, %c0_6] : memref<2x4x256xf32, #tpu.memory_space<vmem>>, vector<2x4x256xf32>
    %7 = math.absf %6 : vector<2x4x256xf32>
    %cst = arith.constant dense<0.000000e+00> : vector<2x256xf32>
    %8 = vector.multi_reduction <add>, %7, %cst [1] : vector<2x4x256xf32> to vector<2x256xf32>
    %9 = vector.shape_cast %8 : vector<2x256xf32> to vector<2x1x256xf32>
    %cst_7 = arith.constant 0.000000e+00 : f32
    %10 = vector.broadcast %cst_7 : f32 to vector<2x1x256xf32>
    %11 = arith.cmpf ogt, %9, %10 : vector<2x1x256xf32>
    %12 = arith.mulf %5, %6 : vector<2x4x256xf32>
    %cst_8 = arith.constant dense<0.000000e+00> : vector<2x256xf32>
    %13 = vector.multi_reduction <add>, %12, %cst_8 [1] : vector<2x4x256xf32> to vector<2x256xf32>
    %14 = vector.shape_cast %13 : vector<2x256xf32> to vector<2x1x256xf32>
    %15 = arith.extui %11 : vector<2x1x256xi1> to vector<2x1x256xi32>
    %16 = arith.sitofp %15 : vector<2x1x256xi32> to vector<2x1x256xf32>
    %c0_9 = arith.constant 0 : index
    %17 = memref.load %arg5[%c0_9] : memref<1xf32, #tpu.memory_space<smem>>
    %18 = arith.mulf %14, %16 : vector<2x1x256xf32>
    %19 = vector.shape_cast %18 : vector<2x1x256xf32> to vector<1x2x1x256xf32>
    %cst_10 = arith.constant dense<0.000000e+00> : vector<1xf32>
    %20 = vector.multi_reduction <add>, %19, %cst_10 [1, 2, 3] : vector<1x2x1x256xf32> to vector<1xf32>
    %21 = vector.shape_cast %20 : vector<1xf32> to vector<1x1x1x1xf32>
    %22 = vector.extract %21[0, 0, 0, 0] : f32 from vector<1x1x1x1xf32>
    %23 = arith.addf %17, %22 : f32
    %c0_11 = arith.constant 0 : index
    %24 = memref.load %arg5[%c0_11] : memref<1xf32, #tpu.memory_space<smem>>
    memref.store %23, %arg5[%c0_11] : memref<1xf32, #tpu.memory_space<smem>>
    %c0_12 = arith.constant 0 : index
    %25 = memref.load %arg6[%c0_12] : memref<1xf32, #tpu.memory_space<smem>>
    %26 = vector.shape_cast %16 : vector<2x1x256xf32> to vector<1x2x1x256xf32>
    %cst_13 = arith.constant dense<0.000000e+00> : vector<1xf32>
    %27 = vector.multi_reduction <add>, %26, %cst_13 [1, 2, 3] : vector<1x2x1x256xf32> to vector<1xf32>
    %28 = vector.shape_cast %27 : vector<1xf32> to vector<1x1x1x1xf32>
    %29 = vector.extract %28[0, 0, 0, 0] : f32 from vector<1x1x1x1xf32>
    %30 = arith.addf %25, %29 : f32
    %c0_14 = arith.constant 0 : index
    %31 = memref.load %arg6[%c0_14] : memref<1xf32, #tpu.memory_space<smem>>
    memref.store %30, %arg6[%c0_14] : memref<1xf32, #tpu.memory_space<smem>>
    %c0_i32_15 = arith.constant 0 : i32
    %32 = arith.cmpi eq, %arg0, %c0_i32_15 : i32
    %c0_i32_16 = arith.constant 0 : i32
    %33 = arith.cmpi eq, %arg1, %c0_i32_16 : i32
    %34 = arith.andi %32, %33 : i1
    %35 = arith.extui %34 : i1 to i32
    %c0_i32_17 = arith.constant 0 : i32
    %36 = arith.cmpi ne, %35, %c0_i32_17 : i32
    scf.if %36 {
      %c0_18 = arith.constant 0 : index
      %37 = memref.load %arg5[%c0_18] : memref<1xf32, #tpu.memory_space<smem>>
      %c0_19 = arith.constant 0 : index
      %38 = memref.load %arg6[%c0_19] : memref<1xf32, #tpu.memory_space<smem>>
      %39 = arith.divf %37, %38 : f32
      %cst_20 = arith.constant 1.000000e+00 : f32
      %40 = arith.subf %cst_20, %39 : f32
      %c0_21 = arith.constant 0 : index
      %c0_22 = arith.constant 0 : index
      %41 = memref.load %arg4[%c0_21, %c0_22] : memref<1x1xf32, #tpu.memory_space<smem>>
      memref.store %40, %arg4[%c0_21, %c0_22] : memref<1x1xf32, #tpu.memory_space<smem>>
    } else {
    }
    return
  }
  func.func @transform_0(%arg0: i32, %arg1: i32) -> (i32, i32, i32) {
    %c0_i32 = arith.constant 0 : i32
    %c0_i32_0 = arith.constant 0 : i32
    return %arg0, %c0_i32, %arg1 : i32, i32, i32
  }
  func.func @transform_1(%arg0: i32, %arg1: i32) -> (i32, i32, i32) {
    %c0_i32 = arith.constant 0 : i32
    %c0_i32_0 = arith.constant 0 : i32
    return %arg0, %c0_i32, %arg1 : i32, i32, i32
  }
  func.func @transform_2(%arg0: i32, %arg1: i32) -> (i32, i32) {
    %c0_i32 = arith.constant 0 : i32
    %c0_i32_0 = arith.constant 0 : i32
    %c0_i32_1 = arith.constant 0 : i32
    return %c0_i32, %c0_i32_0 : i32, i32
  }
}

</mosaic_0001>

<bundles_post_ra>
// kernel: tpu_custom_call.1
= control target key start
LH: loop header
LB: loop body
LE: loop exit
PB: predicated region body
PF: predicated region fallthrough
CT: control target
= control target key end

     0   :  { %7 = vsyncpa [#allocation5], 0  ;;  %s373_s0 = inlined_call_operand.hbm [shape: f32[2,4,256], index: 0, kind: input, shape index: {}]   ;;  %s374_s1 = inlined_call_operand.hbm [shape: f32[2,4,256], index: 1, kind: input, shape index: {}]   ;;  %s375_s2 = inlined_call_operand.hbm [shape: f32[1,1], index: 2, kind: output, shape index: {}]  }
   0x1   :  { %8 = vsyncpa [#allocation8], 0 }
   0x2   :  { %9 = vsyncpa [#allocation6], 0  ;;  %s14_s11 = sshll.u32 %s373_s0, 4  ;;  %s327_s12 = smov [#allocation4]   ;;  %s15_s11 = int_to_ptr.hbm [resolvable:$true] %s14_s11 }
   0x3   :  { %s16_s13 = sshll.u32 %s327_s12, 4  ;;  %s27_s16 = sshll.u32 %s374_s1, 4  ;;  %s17_s13 = int_to_ptr.vmem [resolvable:$true] %s16_s13  ;;  %s28_s16 = int_to_ptr.hbm [resolvable:$true] %s27_s16 }
   0x4   :  { %s328_s17 = smov 128   ;;  %s329_s18 = smov 8  }
   0x5   :  { %22 = dma.hbm_to_vmem [thread:$0]  %s15_s11, 256, %s17_s13, [#allocation5], %s328_s17, %s328_s17, %s329_s18  }
   0x6   :  { %s330_s19 = smov [#allocation7]  }
   0x7   :  { %s29_s20 = sshll.u32 %s330_s19, 4  ;;  %s30_s20 = int_to_ptr.vmem [resolvable:$true] %s29_s20 }
   0x8   :  { %35 = dma.hbm_to_vmem [thread:$0]  %s28_s16, 256, %s30_s20, [#allocation8], %s328_s17, %s328_s17, %s329_s18  }
   0x9   :  { %321 = dma.done.wait [#allocation5], 256  }
   0xa   :  { %322 = vsyncadd [#allocation5], 4294967040 }
   0xb   :  { %323 = dma.done.wait [#allocation8], 256  }
   0xc   :  { %324 = vsyncadd [#allocation8], 4294967040  ;;  %v56_v0 = vld [vmem:[#allocation7] sm:$0xff]  ;;  %v57_v1 = vld [vmem:[#allocation7 + $0x8] sm:$0xff]  ;;  %vm73_vm0 = vcmask 1043456   ;;  %vm162_vm5 = vcmask 1040384  }
   0xd   :  { %v58_v2 = vand.u32 2147483647, %v56_v0  ;;  %v59_v3 = vand.u32 2147483647, %v57_v1  ;;  %v54_v4 = vld [vmem:[#allocation4] sm:$0xff]  ;;  %v55_v5 = vld [vmem:[#allocation4 + $0x8] sm:$0xff] }
   0xe   :  { %v106_v6 = vmul.f32 %v56_v0, %v54_v4  ;;  %v107_v7 = vmul.f32 %v57_v1, %v55_v5  ;;  %v331_v4 = vmov 0.0   ;;  %s231_s23 = sshll.u32 %s375_s2, 4  ;;  %s332_s27 = smov [#allocation9]   ;;  %s232_s23 = int_to_ptr.hbm [resolvable:$true] %s231_s23 }
   0xf   :  { %62 = vst [vmem:[#allocation1] ss:$2 sm:$0xff] %v58_v2 }
  0x10   :  { %66 = vst [vmem:[#allocation1 + $0x10] ss:$2 sm:$0xff] %v59_v3 }
  0x16   :  { %v63_v8 = vld.sshfl [vmem:[#allocation1] sm:$0xff pattern:$0x75316420]  ;;  %v64_v9 = vld.sshfl [vmem:[#allocation1 + $0x8] sm:$0xff pattern:$0x75316420] }
  0x17   :  { %v67_v10 = vld.sshfl [vmem:[#allocation1 + $0x10] sm:$0xff pattern:$0x75316420]  ;;  %v68_v11 = vld.sshfl [vmem:[#allocation1 + $0x18] sm:$0xff pattern:$0x75316420] }
  0x18   :  { %v74_v12 = vsel %vm73_vm0, %v63_v8, 0.0  ;;  %v81_v13 = vsel %vm73_vm0, %v64_v9, 0.0  ;;  %v88_v14 = vsel %vm73_vm0, %v67_v10, 0.0  ;;  %v95_v15 = vsel %vm73_vm0, %v68_v11, 0.0  ;;  %110 = vst [vmem:[#allocation1] ss:$2 sm:$0xff] %v106_v6 }
  0x19   :  { %v75_v16 = vrot.slane %v74_v12, 4  ;;  %v82_v17 = vrot.slane %v81_v13, 4  ;;  %v89_v18 = vrot.slane %v88_v14, 4  ;;  %v96_v19 = vrot.slane %v95_v15, 4  ;;  %114 = vst [vmem:[#allocation1 + $0x10] ss:$2 sm:$0xff] %v107_v7 }
  0x1b   :  { %v76_v20 = vadd.f32 %v75_v16, %v74_v12  ;;  %v83_v21 = vadd.f32 %v82_v17, %v81_v13  ;;  %v90_v22 = vadd.f32 %v89_v18, %v88_v14  ;;  %v97_v23 = vadd.f32 %v96_v19, %v95_v15 }
  0x1d   :  { %v77_v24 = vrot.slane %v76_v20, 2  ;;  %v84_v25 = vrot.slane %v83_v21, 2  ;;  %v91_v26 = vrot.slane %v90_v22, 2  ;;  %v98_v27 = vrot.slane %v97_v23, 2 }
  0x1f   :  { %v78_v28 = vadd.f32 %v77_v24, %v76_v20  ;;  %v85_v29 = vadd.f32 %v84_v25, %v83_v21  ;;  %v92_v30 = vadd.f32 %v91_v26, %v90_v22  ;;  %v99_v31 = vadd.f32 %v98_v27, %v97_v23  ;;  %v111_v32 = vld.sshfl [vmem:[#allocation1] sm:$0xff pattern:$0x75316420]  ;;  %v112_v33 = vld.sshfl [vmem:[#allocation1 + $0x8] sm:$0xff pattern:$0x75316420] }
  0x20   :  { %v115_v34 = vld.sshfl [vmem:[#allocation1 + $0x10] sm:$0xff pattern:$0x75316420]  ;;  %v116_v35 = vld.sshfl [vmem:[#allocation1 + $0x18] sm:$0xff pattern:$0x75316420] }
  0x21   :  { %v79_v36 = vrot.slane %v78_v28, 1  ;;  %v86_v37 = vrot.slane %v85_v29, 1  ;;  %v93_v38 = vrot.slane %v92_v30, 1  ;;  %v100_v39 = vrot.slane %v99_v31, 1 }
  0x22   :  { %v121_v40 = vsel %vm73_vm0, %v111_v32, 0.0  ;;  %v128_v41 = vsel %vm73_vm0, %v112_v33, 0.0  ;;  %v135_v42 = vsel %vm73_vm0, %v115_v34, 0.0  ;;  %v142_v43 = vsel %vm73_vm0, %v116_v35, 0.0 }
  0x23   :  { %v122_v44 = vrot.slane %v121_v40, 4  ;;  %v129_v45 = vrot.slane %v128_v41, 4  ;;  %v136_v46 = vrot.slane %v135_v42, 4  ;;  %v143_v47 = vrot.slane %v142_v43, 4 }
  0x24   :  { %v80_v48 = vadd.f32 %v79_v36, %v78_v28  ;;  %v87_v49 = vadd.f32 %v86_v37, %v85_v29  ;;  %v94_v50 = vadd.f32 %v93_v38, %v92_v30  ;;  %v101_v51 = vadd.f32 %v100_v39, %v99_v31 }
  0x25   :  { %v123_v52 = vadd.f32 %v122_v44, %v121_v40  ;;  %v130_v53 = vadd.f32 %v129_v45, %v128_v41  ;;  %v137_v54 = vadd.f32 %v136_v46, %v135_v42  ;;  %v144_v55 = vadd.f32 %v143_v47, %v142_v43 }
  0x26   :  { %vm102_vm1 = vcmp.gt.f32.partialorder %v80_v48, 0.0  ;;  %vm103_vm2 = vcmp.gt.f32.partialorder %v87_v49, 0.0  ;;  %vm104_vm3 = vcmp.gt.f32.partialorder %v94_v50, 0.0  ;;  %vm105_vm4 = vcmp.gt.f32.partialorder %v101_v51, 0.0 }
  0x27   :  { %v124_v56 = vrot.slane %v123_v52, 2  ;;  %v131_v57 = vrot.slane %v130_v53, 2  ;;  %v138_v58 = vrot.slane %v137_v54, 2  ;;  %v145_v59 = vrot.slane %v144_v55, 2 }
  0x28   :  { %v243_v5 = vsel %vm102_vm1, 1.0, %v331_v4  ;;  %v244_v6 = vsel %vm103_vm2, 1.0, %v331_v4  ;;  %v245_v7 = vsel %vm104_vm3, 1.0, %v331_v4  ;;  %v246_v8 = vsel %vm105_vm4, 1.0, %v331_v4 }
  0x29   :  { %v125_v60 = vadd.f32 %v124_v56, %v123_v52  ;;  %v132_v61 = vadd.f32 %v131_v57, %v130_v53  ;;  %v139_v62 = vadd.f32 %v138_v58, %v137_v54  ;;  %v146_v63 = vadd.f32 %v145_v59, %v144_v55 }
  0x2a   :  { %v183_v17 = vsel %vm162_vm5, %v243_v5, 0.0  ;;  %v184_v21 = vsel %vm162_vm5, %v244_v6, 0.0  ;;  %v186_v26 = vsel %vm162_vm5, %v245_v7, 0.0  ;;  %v188_v29 = vsel %vm162_vm5, %v246_v8, 0.0 }
  0x2b   :  { %v126_v0 = vrot.slane %v125_v60, 1  ;;  %v133_v1 = vrot.slane %v132_v61, 1  ;;  %v140_v2 = vrot.slane %v139_v62, 1  ;;  %v147_v3 = vrot.slane %v146_v63, 1 }
  0x2c   :  { %v185_v25 = vadd.f32 %v184_v21, %v183_v17 }
  0x2d   :  { %v127_v9 = vadd.f32 %v126_v0, %v125_v60  ;;  %v134_v10 = vadd.f32 %v133_v1, %v132_v61  ;;  %v141_v11 = vadd.f32 %v140_v2, %v139_v62  ;;  %v148_v12 = vadd.f32 %v147_v3, %v146_v63 }
  0x2e   :  { %v187_v28 = vadd.f32 %v186_v26, %v185_v25 }
  0x2f   :  { %v158_v13 = vmul.f32 %v243_v5, %v127_v9  ;;  %v159_v14 = vmul.f32 %v244_v6, %v134_v10  ;;  %v160_v15 = vmul.f32 %v245_v7, %v141_v11  ;;  %v161_v16 = vmul.f32 %v246_v8, %v148_v12 }
  0x30   :  { %v189_v30 = vadd.f32 %v188_v29, %v187_v28 }
  0x31   :  { %v163_v18 = vsel %vm162_vm5, %v158_v13, 0.0  ;;  %v164_v19 = vsel %vm162_vm5, %v159_v14, 0.0  ;;  %v166_v20 = vsel %vm162_vm5, %v160_v15, 0.0  ;;  %v168_v23 = vsel %vm162_vm5, %v161_v16, 0.0 }
  0x32   :  { %v165_v22 = vadd.f32 %v164_v19, %v163_v18 }
  0x34   :  { %v167_v24 = vadd.f32 %v166_v20, %v165_v22 }
  0x36   :  { %v169_v27 = vadd.f32 %v168_v23, %v167_v24 }
  0x38   :  { %170 = vadd.xlane.f32.xlu0 %v169_v27 }
  0x40   :  { %190 = vadd.xlane.f32.xlu0 %v189_v30 }
  0xab   :  { %v171_v31 = vpop.xlane.xlu0 %170 }
  0xac   :  { %v172_v32 = vrot.slane %v171_v31, 4 }
  0xae   :  { %v173_v33 = vadd.f32 %v172_v32, %v171_v31 }
  0xb0   :  { %v174_v34 = vrot.slane %v173_v33, 2 }
  0xb2   :  { %v175_v35 = vadd.f32 %v174_v34, %v173_v33 }
  0xb3   :  { %v191_v36 = vpop.xlane.xlu0 %190 }
  0xb4   :  { %v192_v37 = vrot.slane %v191_v36, 4  ;;  %v176_v38 = vrot.slane %v175_v35, 1 }
  0xb6   :  { %v193_v39 = vadd.f32 %v192_v37, %v191_v36  ;;  %v177_v40 = vadd.f32 %v176_v38, %v175_v35 }
  0xb8   :  { %v194_v41 = vrot.slane %v193_v39, 2  ;;  %247 = vpush %v177_v40 }
  0xba   :  { %v195_v42 = vadd.f32 %v194_v41, %v193_v39 }
  0xbc   :  { %v196_v43 = vrot.slane %v195_v42, 1 }
  0xbe   :  { %v197_v44 = vadd.f32 %v196_v43, %v195_v42 }
  0xc0   :  { %249 = vpush %v197_v44 }
  0xe9   :  { %s248_s0 = spop %247 }
  0xf1   :  { %s250_s1 = spop %249 }
  0xf2   :  { %v206_v45 = vstv %s250_s1 }
  0xf3   :  { %259 = vrcp.f32 %v206_v45  ;;  %v218_v49 = vand.u32 2147483648, %v206_v45  ;;  %v216_v51 = vand.u32 2147483647, %v206_v45  ;;  %vm212_vm7 = vweird.f32 %v206_v45 }
  0xf5   :  { %v219_v53 = vor.u32 1.1754944e-38, %v218_v49  ;;  %vm217_vm9 = vcmp.eq.f32.partialorder %v216_v51, 8.507059e+37 }
  0xf9   :  { %v260_v46 = vpop.eup %259 }
  0xfa   :  { %v208_v47 = vmul.f32 %v260_v46, %v206_v45  ;;  %vm213_vm6 = vweird.f32 %v260_v46 }
  0xfb   :  { %vm214_vm8 = vmor %vm212_vm7, %vm213_vm6 }
  0xfc   :  { %v209_v48 = vsub.f32 1.0, %v208_v47 }
  0xfe   :  { %v210_v50 = vmul.f32 %v260_v46, %v209_v48 }
 0x100   :  { %v211_v52 = vadd.f32 %v260_v46, %v210_v50 }
 0x102   :  { %v215_v54 = vsel %vm214_vm8, %v260_v46, %v211_v52 }
 0x103   :  { %v220_v55 = vsel %vm217_vm9, %v219_v53, %v215_v54 }
 0x104   :  { %251 = vpush %v220_v55 }
 0x135   :  { %s252_s24 = spop %251 }
 0x136   :  { %s222_s25 = smul.f32 %s252_s24, %s248_s0 }
 0x138   :  { %s223_s26 = ssub.f32 1.0, %s222_s25 }
 0x13a   :  { %225 = sst [smem:[#allocation9]] %s223_s26 }
 0x13b   :  { %234 = dma.smem_to_hbm %s332_s27, 16, %s232_s23, [#allocation6]  }
 0x13c   :  { %325 = dma.done.wait [#allocation6], 16  }
 0x13d   :  { %326 = vsyncadd [#allocation6], 4294967280 }
 0x13e   :  { %239 = sfence }
 0x13f   :  { %240 = vsyncpa [#allocation5], 1 }
 0x140   :  { %241 = vsyncpa [#allocation8], 1 }
 0x141   :  { %242 = vsyncpa [#allocation6], 1 }

</bundles_post_ra>
